<compile_context>
chip_gen: v5e
topology: v5e:2x2
jax: 0.10.0
libtpu: 0.0.40
codegen_flags: <defaults>
</compile_context>

<pallas_src>
import jax
import jax.numpy as jnp
from jax import lax
from jax.experimental import pallas as pl
from jax.experimental.pallas import tpu as pltpu

# ----------------------------- configuration --------------------------------
N, IN_CHANNELS, H, W = 2, 4, 16, 16
OUT_CHANNELS = 8
ATROUS_RATES = (2, 4)
BN_EPS = 1e-5


# ------------------------------- the kernel ---------------------------------
def aspp_kernel(xall_ref, wall_ref, wproj_ref, bslab_ref, o_ref):
    """Single grid step, all images folded onto the lane axis.

    xall_ref : (K, N*HW)        [ones | im2col(rate0) | im2col(rate1)], zero-padded K
    wall_ref : (3*Cout, K)      block-diagonal fused branch weights (BN scale+bias folded)
    wproj_ref: (Cout, 3*Cout)   fused concat+1x1 projection weights (proj BN scale folded)
    bslab_ref: (Cout, N*HW)     per-image bias = proj-BN bias + pooled-branch contribution
    o_ref    : (Cout, N*HW)     lane-dense output
    """
    # fused branch convs (1x1 + both dilated 3x3) + folded BN + ReLU: one MXU push
    y = jnp.maximum(
        jnp.dot(wall_ref[...], xall_ref[...], preferred_element_type=jnp.float32),
        0.0)                                                    # (3*Cout, N*HW)
    # fused concat + 1x1 projection; pooled branch + proj BN bias prefolded into bslab
    out = jnp.dot(wproj_ref[...], y, preferred_element_type=jnp.float32) + bslab_ref[...]
    # Dropout(0.5) is identity in eval mode
    o_ref[...] = jnp.maximum(out, 0.0).astype(o_ref.dtype)


# ------------------------------- wrapper -------------------------------------
def aspp_forward(x_nchw, params):
    x = jnp.transpose(x_nchw, (0, 2, 3, 1)).astype(jnp.float32)   # NCHW -> NHWC
    n, h, w_, c_in = x.shape
    hw = h * w_
    nhw = n * hw
    c_out = OUT_CHANNELS
    rates = ATROUS_RATES
    n_rates = len(rates)
    nbk = 1 + n_rates                      # kernel-side branches (pooling handled as bias)

    scales, biases = params['scales'], params['biases']
    sproj = params['sproj'].reshape(c_out)
    bproj = params['bproj'].reshape(c_out)

    # ---------- X_all: [ones | im2col(rate0) | im2col(rate1)]  (K, N*HW) ------
    ims = []
    for d in rates:
        xpad = jnp.pad(x, ((0, 0), (d, d), (d, d), (0, 0)))
        patches = [xpad[:, ky * d:ky * d + h, kx * d:kx * d + w_, :]
                   for ky in range(3) for kx in range(3)]
        im = jnp.stack(patches, axis=3)                        # (N, H, W, 9, Cin)
        ims.append(im.reshape(n, hw, 9 * c_in))
    ones = jnp.ones((n, hw, 1), jnp.float32)
    xall = jnp.concatenate([ones] + ims, axis=-1)              # (N, HW, K)
    k_dim = xall.shape[-1]                                     # 1 + R*9*Cin
    xall = xall.reshape(nhw, k_dim).T                          # (K, N*HW), lanes = n*HW+idx
    k_pad = (-k_dim) % 8
    if k_pad:
        xall = jnp.concatenate([xall, jnp.zeros((k_pad, nhw), jnp.float32)], axis=0)
    kp = k_dim + k_pad

    # ---------- W_all: block-diagonal fused branch weights (BN folded) --------
    wall = jnp.zeros((nbk * c_out, kp), jnp.float32)
    # branch 0 (1x1 conv) == center tap (index 4) of the rate-0 im2col block
    w0_s = (params['w0'] * scales[0][None, :]).T                          # (Cout, Cin)
    wall = wall.at[0:c_out, 0].set(biases[0])                             # bias via ones row
    c0 = 1 + 4 * c_in
    wall = wall.at[0:c_out, c0:c0 + c_in].set(w0_s)
    for r in range(n_rates):
        wd_s = (params['wd'][r].reshape(9 * c_in, c_out) * scales[1 + r][None, :]).T
        rs = (1 + r) * c_out
        cs = 1 + r * 9 * c_in
        wall = wall.at[rs:rs + c_out, 0].set(biases[1 + r])
        wall = wall.at[rs:rs + c_out, cs:cs + 9 * c_in].set(wd_s)

    # ---------- fused projection weight (proj BN scale folded) ---------------
    wproj = jnp.concatenate(
        [sproj[:, None] * params['wproj'][b].T for b in range(nbk)], axis=1)  # (Cout, 3*Cout)

    # ---------- pooled branch folded into a per-image projection bias --------
    pooled = jnp.mean(x, axis=(1, 2))                                      # (N, Cin)
    wp_s = params['wp'] * scales[-1][None, :]                              # (Cin, Cout)
    yp = jnp.maximum(pooled @ wp_s + biases[-1][None, :], 0.0)             # (N, Cout)
    bpool = (yp @ params['wproj'][-1]) * sproj[None, :] + bproj[None, :]   # (N, Cout)
    bslab = jnp.broadcast_to(bpool.T[:, :, None], (c_out, n, hw)).reshape(c_out, nhw)

    out = pl.pallas_call(
        aspp_kernel,
        out_shape=jax.ShapeDtypeStruct((c_out, nhw), jnp.float32),
        grid=(1,),
        in_specs=[
            pl.BlockSpec((kp, nhw), lambda i: (0, 0)),
            pl.BlockSpec((nbk * c_out, kp), lambda i: (0, 0)),
            pl.BlockSpec((c_out, nbk * c_out), lambda i: (0, 0)),
            pl.BlockSpec((c_out, nhw), lambda i: (0, 0)),
        ],
        out_specs=pl.BlockSpec((c_out, nhw), lambda i: (0, 0)),
        compiler_params=pltpu.CompilerParams(
            dimension_semantics=("arbitrary",)),
    )(xall, wall, wproj, bslab)

    # (Cout, N*HW) -> NHWC (free wrapper-side layout plumbing)
    return out.reshape(c_out, n, h, w_).transpose(1, 2, 3, 0)


# --------------------------- deterministic params ----------------------------
def make_params(key):
    nb = len(ATROUS_RATES) + 2
    ks = jax.random.split(key, 10)
    w0 = jax.random.normal(ks[0], (IN_CHANNELS, OUT_CHANNELS), jnp.float32) * 0.1
    wd = jax.random.normal(ks[1], (len(ATROUS_RATES), 9, IN_CHANNELS, OUT_CHANNELS),
                           jnp.float32) * 0.1
    wp = jax.random.normal(ks[2], (IN_CHANNELS, OUT_CHANNELS), jnp.float32) * 0.1
    wproj = jax.random.normal(ks[3], (nb, OUT_CHANNELS, OUT_CHANNELS),
                              jnp.float32) * 0.1
    # per-branch BatchNorm parameters (running stats), folded to scale/bias
    gamma = 1.0 + 0.1 * jax.random.normal(ks[4], (nb, OUT_CHANNELS), jnp.float32)
    beta = 0.1 * jax.random.normal(ks[5], (nb, OUT_CHANNELS), jnp.float32)
    mean = 0.1 * jax.random.normal(ks[6], (nb, OUT_CHANNELS), jnp.float32)
    var = jnp.abs(jax.random.normal(ks[7], (nb, OUT_CHANNELS), jnp.float32)) + 0.5
    scales = gamma / jnp.sqrt(var + BN_EPS)
    biases = beta - mean * scales
    # projection BatchNorm
    gp = 1.0 + 0.1 * jax.random.normal(ks[8], (1, OUT_CHANNELS), jnp.float32)
    bp = 0.1 * jax.random.normal(ks[9], (1, OUT_CHANNELS), jnp.float32)
    mp = jnp.zeros((1, OUT_CHANNELS), jnp.float32)
    vp = jnp.ones((1, OUT_CHANNELS), jnp.float32)
    sproj = gp / jnp.sqrt(vp + BN_EPS)
    bproj = bp - mp * sproj
    return dict(w0=w0, wd=wd, wp=wp, wproj=wproj, scales=scales, biases=biases,
                sproj=sproj, bproj=bproj)


# ------------------------------ JAX reference ---------------------------------
def aspp_reference(x_nchw, p):
    x = jnp.transpose(x_nchw, (0, 2, 3, 1)).astype(jnp.float32)

    def bn_relu(y, s, b):
        return jnp.maximum(y * s + b, 0.0)

    branches = []
    branches.append(bn_relu(jnp.einsum('nhwc,co->nhwo', x, p['w0']),
                            p['scales'][0], p['biases'][0]))
    for r_idx, d in enumerate(ATROUS_RATES):
        wd = p['wd'][r_idx].reshape(3, 3, IN_CHANNELS, OUT_CHANNELS)
        y = lax.conv_general_dilated(
            x, wd, (1, 1), [(d, d), (d, d)], rhs_dilation=(d, d),
            dimension_numbers=('NHWC', 'HWIO', 'NHWC'))
        branches.append(bn_relu(y, p['scales'][1 + r_idx], p['biases'][1 + r_idx]))
    pooled = jnp.mean(x, axis=(1, 2))
    yp = bn_relu(pooled @ p['wp'], p['scales'][-1], p['biases'][-1])
    branches.append(jnp.broadcast_to(yp[:, None, None, :], (N, H, W, OUT_CHANNELS)))
    cat = jnp.concatenate(branches, axis=-1)
    wproj_flat = p['wproj'].reshape(-1, OUT_CHANNELS)
    proj = jnp.einsum('nhwc,co->nhwo', cat, wproj_flat)
    return bn_relu(proj, p['sproj'].reshape(-1), p['bproj'].reshape(-1))


# ---------------------------------- main --------------------------------------
if __name__ == "__main__":
    key = jax.random.PRNGKey(0)
    kx, kp_ = jax.random.split(key)
    x_nchw = jax.random.normal(kx, (N, IN_CHANNELS, H, W), jnp.float32)
    params = make_params(kp_)

    out = aspp_forward(x_nchw, params)
    out = jax.block_until_ready(out)

    ref = aspp_reference(x_nchw, params)
    assert out.shape == (N, H, W, OUT_CHANNELS)
    assert jnp.allclose(out, ref, rtol=1e-4, atol=1e-4), "mismatch vs JAX reference"

    print("KERNEL_OK")
</pallas_src>

<mosaic_0001>
module attributes {stable_mosaic.version = 11 : i64} {
  func.func @aspp_kernel(%arg0: i32, %arg1: memref<80x512xf32, #tpu.memory_space<vmem>>, %arg2: memref<24x80xf32, #tpu.memory_space<vmem>>, %arg3: memref<8x24xf32, #tpu.memory_space<vmem>>, %arg4: memref<8x512xf32, #tpu.memory_space<vmem>>, %arg5: memref<8x512xf32, #tpu.memory_space<vmem>>) attributes {dimension_semantics = [#tpu.dimension_semantics<arbitrary>], iteration_bounds = array<i64: 1>, scalar_prefetch = 0 : i64, scratch_operands = 0 : i64, tpu.core_type = #tpu.core_type<tc>, window_params = [{pipeline_mode = #tpu.pipeline_mode<synchronous>, transform_indices = @transform_0, window_bounds = array<i64: 80, 512>}, {pipeline_mode = #tpu.pipeline_mode<synchronous>, transform_indices = @transform_1, window_bounds = array<i64: 24, 80>}, {pipeline_mode = #tpu.pipeline_mode<synchronous>, transform_indices = @transform_2, window_bounds = array<i64: 8, 24>}, {pipeline_mode = #tpu.pipeline_mode<synchronous>, transform_indices = @transform_3, window_bounds = array<i64: 8, 512>}, {pipeline_mode = #tpu.pipeline_mode<synchronous>, transform_indices = @transform_4, window_bounds = array<i64: 8, 512>}]} {
    %c0 = arith.constant 0 : index
    %c0_0 = arith.constant 0 : index
    %0 = vector.load %arg2[%c0, %c0_0] : memref<24x80xf32, #tpu.memory_space<vmem>>, vector<24x80xf32>
    %c0_1 = arith.constant 0 : index
    %c0_2 = arith.constant 0 : index
    %1 = vector.load %arg1[%c0_1, %c0_2] : memref<80x512xf32, #tpu.memory_space<vmem>>, vector<80x512xf32>
    %cst = arith.constant dense<0.000000e+00> : vector<24x512xf32>
    %2 = tpu.matmul %0, %1, %cst {dimension_numbers = #tpu.dot_dimension_numbers<[1], [0], [0], [1], [0, 0, 1, 1], [], []>} : vector<24x80xf32>, vector<80x512xf32>, vector<24x512xf32> -> vector<24x512xf32>
    %cst_3 = arith.constant 0.000000e+00 : f32
    %3 = vector.broadcast %cst_3 : f32 to vector<24x512xf32>
    %4 = arith.maximumf %2, %3 : vector<24x512xf32>
    %c0_4 = arith.constant 0 : index
    %c0_5 = arith.constant 0 : index
    %5 = vector.load %arg3[%c0_4, %c0_5] : memref<8x24xf32, #tpu.memory_space<vmem>>, vector<8x24xf32>
    %cst_6 = arith.constant dense<0.000000e+00> : vector<8x512xf32>
    %6 = tpu.matmul %5, %4, %cst_6 {dimension_numbers = #tpu.dot_dimension_numbers<[1], [0], [0], [1], [0, 0, 1, 1], [], []>} : vector<8x24xf32>, vector<24x512xf32>, vector<8x512xf32> -> vector<8x512xf32>
    %c0_7 = arith.constant 0 : index
    %c0_8 = arith.constant 0 : index
    %7 = vector.load %arg4[%c0_7, %c0_8] : memref<8x512xf32, #tpu.memory_space<vmem>>, vector<8x512xf32>
    %8 = arith.addf %6, %7 : vector<8x512xf32>
    %cst_9 = arith.constant 0.000000e+00 : f32
    %9 = vector.broadcast %cst_9 : f32 to vector<8x512xf32>
    %10 = arith.maximumf %8, %9 : vector<8x512xf32>
    %c0_10 = arith.constant 0 : index
    %c0_11 = arith.constant 0 : index
    %11 = vector.load %arg5[%c0_10, %c0_11] : memref<8x512xf32, #tpu.memory_space<vmem>>, vector<8x512xf32>
    tpu.vector_store %arg5[%c0_10, %c0_11], %10 {strides = array<i32>} : memref<8x512xf32, #tpu.memory_space<vmem>>, vector<8x512xf32>,
    return
  }
  func.func @transform_0(%arg0: i32) -> (i32, i32) {
    %c0_i32 = arith.constant 0 : i32
    %c0_i32_0 = arith.constant 0 : i32
    %c0_i32_1 = arith.constant 0 : i32
    return %c0_i32, %c0_i32_0 : i32, i32
  }
  func.func @transform_1(%arg0: i32) -> (i32, i32) {
    %c0_i32 = arith.constant 0 : i32
    %c0_i32_0 = arith.constant 0 : i32
    %c0_i32_1 = arith.constant 0 : i32
    return %c0_i32, %c0_i32_0 : i32, i32
  }
  func.func @transform_2(%arg0: i32) -> (i32, i32) {
    %c0_i32 = arith.constant 0 : i32
    %c0_i32_0 = arith.constant 0 : i32
    %c0_i32_1 = arith.constant 0 : i32
    return %c0_i32, %c0_i32_0 : i32, i32
  }
  func.func @transform_3(%arg0: i32) -> (i32, i32) {
    %c0_i32 = arith.constant 0 : i32
    %c0_i32_0 = arith.constant 0 : i32
    %c0_i32_1 = arith.constant 0 : i32
    return %c0_i32, %c0_i32_0 : i32, i32
  }
  func.func @transform_4(%arg0: i32) -> (i32, i32) {
    %c0_i32 = arith.constant 0 : i32
    %c0_i32_0 = arith.constant 0 : i32
    %c0_i32_1 = arith.constant 0 : i32
    return %c0_i32, %c0_i32_0 : i32, i32
  }
}

</mosaic_0001>

<bundles_post_ra>
// kernel: tpu_custom_call.1
= control target key start
LH: loop header
LB: loop body
LE: loop exit
PB: predicated region body
PF: predicated region fallthrough
CT: control target
= control target key end

     0   :  { %9 = vsyncpa [#allocation3], 0  ;;  %s580_s0 = inlined_call_operand.hbm [shape: f32[80,512], index: 0, kind: input, shape index: {}]   ;;  %s581_s1 = inlined_call_operand.hbm [shape: f32[24,80], index: 1, kind: input, shape index: {}]   ;;  %s582_s2 = inlined_call_operand.hbm [shape: f32[8,24], index: 2, kind: input, shape index: {}]   ;;  %s583_s3 = inlined_call_operand.hbm [shape: f32[8,512], index: 3, kind: input, shape index: {}]   ;;  %s584_s4 = inlined_call_operand.hbm [shape: f32[8,512], index: 4, kind: output, shape index: {}]  }
   0x1   :  { %10 = vsyncpa [#allocation6], 0 }
   0x2   :  { %11 = vsyncpa [#allocation9], 0  ;;  %s30_s17 = sshll.u32 %s581_s1, 4  ;;  %s31_s17 = int_to_ptr.hbm [resolvable:$true] %s30_s17 }
   0x3   :  { %12 = vsyncpa [#allocation4], 0  ;;  %s515_s18 = smov [#allocation5]   ;;  %s17_s22 = sshll.u32 %s580_s0, 4  ;;  %s18_s22 = int_to_ptr.hbm [resolvable:$true] %s17_s22 }
   0x4   :  { %s32_s19 = sshll.u32 %s515_s18, 4  ;;  %s516_s23 = smov 128   ;;  %s33_s19 = int_to_ptr.vmem [resolvable:$true] %s32_s19 }
   0x5   :  { %s517_s24 = smov 8   ;;  %s518_s25 = smov [#allocation2]  }
   0x6   :  { %38 = dma.hbm_to_vmem [thread:$0]  %s31_s17, 384, %s33_s19, [#allocation6], %s516_s23, %s516_s23, %s517_s24  }
   0x7   :  { %s19_s26 = sshll.u32 %s518_s25, 4  ;;  %s519_s27 = smov 512   ;;  %s20_s26 = int_to_ptr.vmem [resolvable:$true] %s19_s26 }
   0x8   :  { %s520_s28 = smov 32   ;;  %s44_s30 = sshll.u32 %s582_s2, 4  ;;  %s45_s30 = int_to_ptr.hbm [resolvable:$true] %s44_s30 }
   0x9   :  { %25 = dma.hbm_to_vmem [thread:$0]  %s18_s22, 5120, %s20_s26, [#allocation3], %s519_s27, %s519_s27, %s520_s28  }
   0xa   :  { %s521_s5 = smov [#allocation7]   ;;  %s55_s8 = sshll.u32 %s583_s3, 4  ;;  %s56_s8 = int_to_ptr.hbm [resolvable:$true] %s55_s8 }
   0xb   :  { %s46_s6 = sshll.u32 %s521_s5, 4  ;;  %s522_s9 = smov [#allocation8]   ;;  %s47_s6 = int_to_ptr.vmem [resolvable:$true] %s46_s6 }
   0xc   :  { %49 = dma.hbm_to_vmem [thread:$0]  %s45_s30, 128, %s47_s6, [#allocation6]  }
   0xd   :  { %s57_s10 = sshll.u32 %s522_s9, 4  ;;  %s58_s10 = int_to_ptr.vmem [resolvable:$true] %s57_s10 }
   0xe   :  { %60 = dma.hbm_to_vmem [thread:$0]  %s56_s8, 512, %s58_s10, [#allocation9]  }
   0xf   :  { %507 = dma.done.wait [#allocation3], 5120  }
  0x10   :  { %508 = vsyncadd [#allocation3], 4294962176 }
  0x11   :  { %509 = dma.done.wait [#allocation6], 512  }
  0x12   :  { %510 = vsyncadd [#allocation6], 4294966784 }
  0x13   :  { %511 = dma.done.wait [#allocation9], 512  }
  0x14   :  { %512 = vsyncadd [#allocation9], 4294966784  ;;  %v116_v0 = vld [vmem:[#allocation2 + $0x120] sm:$0xff]  ;;  %v117_v1 = vld [vmem:[#allocation2 + $0x128] sm:$0xff]  ;;  %vm120_vm0 = vcmask 654336   ;;  %vm251_vm1 = vcmask 195584  }
  0x15   :  { %v118_v2 = vld [vmem:[#allocation2 + $0x130] sm:$0xff]  ;;  %136 = vmatpush.msra.mxu0 %v116_v0  ;;  %162 = vmatpush.msra.mxu1 %v117_v1  ;;  %v119_v3 = vld [vmem:[#allocation2 + $0x138] sm:$0xff]  ;;  %v112_v4 = vld [vmem:[#allocation2 + $0x100] sm:$0xff]  ;;  %s523_s2 = smov [#allocation10]   ;;  %s350_s13 = sshll.u32 %s584_s4, 4  ;;  %s351_s13 = int_to_ptr.hbm [resolvable:$true] %s350_s13 }
  0x16   :  { %v113_v5 = vld [vmem:[#allocation2 + $0x108] sm:$0xff]  ;;  %188 = vmatpush.msra.mxu2 %v118_v2  ;;  %214 = vmatpush.msra.mxu3 %v119_v3  ;;  %v114_v6 = vld [vmem:[#allocation2 + $0x110] sm:$0xff]  ;;  %v115_v7 = vld [vmem:[#allocation2 + $0x118] sm:$0xff]  ;;  %s348_s3 = sshll.u32 %s523_s2, 4  ;;  %s349_s3 = int_to_ptr.vmem [resolvable:$true] %s348_s3 }
  0x17   :  { %v108_v8 = vld [vmem:[#allocation2 + $0xe0] sm:$0xff]  ;;  %137 = vmatpush.msra.mxu0 %v112_v4  ;;  %163 = vmatpush.msra.mxu1 %v113_v5  ;;  %v109_v9 = vld [vmem:[#allocation2 + $0xe8] sm:$0xff]  ;;  %v110_v10 = vld [vmem:[#allocation2 + $0xf0] sm:$0xff] }
  0x18   :  { %v111_v11 = vld [vmem:[#allocation2 + $0xf8] sm:$0xff]  ;;  %189 = vmatpush.msra.mxu2 %v114_v6  ;;  %215 = vmatpush.msra.mxu3 %v115_v7  ;;  %v104_v12 = vld [vmem:[#allocation2 + $0xc0] sm:$0xff]  ;;  %v105_v13 = vld [vmem:[#allocation2 + $0xc8] sm:$0xff] }
  0x19   :  { %138 = vmatpush.msra.mxu0 %v108_v8  ;;  %164 = vmatpush.msra.mxu1 %v109_v9  ;;  %v106_v14 = vld [vmem:[#allocation2 + $0xd0] sm:$0xff]  ;;  %v107_v15 = vld [vmem:[#allocation2 + $0xd8] sm:$0xff]  ;;  %v100_v16 = vld [vmem:[#allocation2 + $0xa0] sm:$0xff] }
  0x1a   :  { %190 = vmatpush.msra.mxu2 %v110_v10  ;;  %216 = vmatpush.msra.mxu3 %v111_v11  ;;  %v101_v17 = vld [vmem:[#allocation2 + $0xa8] sm:$0xff]  ;;  %v102_v18 = vld [vmem:[#allocation2 + $0xb0] sm:$0xff]  ;;  %v103_v19 = vld [vmem:[#allocation2 + $0xb8] sm:$0xff] }
  0x1b   :  { %139 = vmatpush.msra.mxu0 %v104_v12  ;;  %165 = vmatpush.msra.mxu1 %v105_v13  ;;  %v96_v20 = vld [vmem:[#allocation2 + $0x80] sm:$0xff]  ;;  %v97_v21 = vld [vmem:[#allocation2 + $0x88] sm:$0xff]  ;;  %v98_v22 = vld [vmem:[#allocation2 + $0x90] sm:$0xff] }
  0x1c   :  { %191 = vmatpush.msra.mxu2 %v106_v14  ;;  %217 = vmatpush.msra.mxu3 %v107_v15  ;;  %v99_v23 = vld [vmem:[#allocation2 + $0x98] sm:$0xff]  ;;  %v92_v24 = vld [vmem:[#allocation2 + $0x60] sm:$0xff]  ;;  %v93_v25 = vld [vmem:[#allocation2 + $0x68] sm:$0xff] }
  0x1d   :  { %140 = vmatpush.msra.mxu0 %v100_v16  ;;  %166 = vmatpush.msra.mxu1 %v101_v17  ;;  %v94_v26 = vld [vmem:[#allocation2 + $0x70] sm:$0xff]  ;;  %v95_v27 = vld [vmem:[#allocation2 + $0x78] sm:$0xff]  ;;  %v88_v28 = vld [vmem:[#allocation2 + $0x40] sm:$0xff] }
  0x1e   :  { %192 = vmatpush.msra.mxu2 %v102_v18  ;;  %218 = vmatpush.msra.mxu3 %v103_v19  ;;  %v89_v29 = vld [vmem:[#allocation2 + $0x48] sm:$0xff]  ;;  %v90_v30 = vld [vmem:[#allocation2 + $0x50] sm:$0xff]  ;;  %v91_v31 = vld [vmem:[#allocation2 + $0x58] sm:$0xff] }
  0x1f   :  { %141 = vmatpush.msra.mxu0 %v96_v20  ;;  %167 = vmatpush.msra.mxu1 %v97_v21  ;;  %v84_v32 = vld [vmem:[#allocation2 + $0x20] sm:$0xff]  ;;  %v85_v33 = vld [vmem:[#allocation2 + $0x28] sm:$0xff]  ;;  %v86_v34 = vld [vmem:[#allocation2 + $0x30] sm:$0xff] }
  0x20   :  { %193 = vmatpush.msra.mxu2 %v98_v22  ;;  %219 = vmatpush.msra.mxu3 %v99_v23  ;;  %v87_v35 = vld [vmem:[#allocation2 + $0x38] sm:$0xff]  ;;  %v80_v36 = vld [vmem:[#allocation2] sm:$0xff]  ;;  %v81_v37 = vld [vmem:[#allocation2 + $0x8] sm:$0xff] }
  0x21   :  { %142 = vmatpush.msra.mxu0 %v92_v24  ;;  %168 = vmatpush.msra.mxu1 %v93_v25  ;;  %v82_v38 = vld [vmem:[#allocation2 + $0x10] sm:$0xff]  ;;  %v83_v39 = vld [vmem:[#allocation2 + $0x18] sm:$0xff]  ;;  %v77_v40 = vld [vmem:[#allocation5] sm:$0xff] }
  0x22   :  { %194 = vmatpush.msra.mxu2 %v94_v26  ;;  %220 = vmatpush.msra.mxu3 %v95_v27  ;;  %v78_v41 = vld [vmem:[#allocation5 + $0x8] sm:$0xff]  ;;  %v79_v42 = vld [vmem:[#allocation5 + $0x10] sm:$0xff]  ;;  %v246_v61 = vld [vmem:[#allocation7] sm:$0xff] }
  0x23   :  { %143 = vmatpush.msra.mxu0 %v88_v28  ;;  %169 = vmatpush.msra.mxu1 %v89_v29  ;;  %v247_v4 = vld [vmem:[#allocation8] sm:$0xff]  ;;  %v248_v5 = vld [vmem:[#allocation8 + $0x8] sm:$0xff]  ;;  %v249_v12 = vld [vmem:[#allocation8 + $0x10] sm:$0xff] }
  0x24   :  { %195 = vmatpush.msra.mxu2 %v90_v30  ;;  %221 = vmatpush.msra.mxu3 %v91_v31  ;;  %v250_v13 = vld [vmem:[#allocation8 + $0x18] sm:$0xff] }
  0x25   :  { %144 = vmatpush.msra.mxu0 %v84_v32  ;;  %170 = vmatpush.msra.mxu1 %v85_v33 }
  0x26   :  { %196 = vmatpush.msra.mxu2 %v86_v34  ;;  %222 = vmatpush.msra.mxu3 %v87_v35 }
  0x27   :  { %145 = vmatpush.msra.mxu0 %v80_v36  ;;  %171 = vmatpush.msra.mxu1 %v81_v37 }
  0x28   :  { %197 = vmatpush.msra.mxu2 %v82_v38  ;;  %223 = vmatpush.msra.mxu3 %v83_v39 }
  0x29   :  { %362 = vmatmul.msk.f32.vlgmr.msra.gmra.mxu0 %vm120_vm0, %v77_v40  ;;  %365 = vmatmul.msk.f32.vlgmr.msra.gmra.mxu1 %vm120_vm0, %v77_v40 }
  0x2a   :  { %368 = vmatmul.msk.f32.vlgmr.msra.gmra.mxu2 %vm120_vm0, %v77_v40  ;;  %371 = vmatmul.msk.f32.vlgmr.msra.gmra.mxu3 %vm120_vm0, %v77_v40 }
  0x31   :  { %363 = vmatmul.msk.f32.gmra.mxu0 %vm120_vm0, %v78_v41  ;;  %366 = vmatmul.msk.f32.gmra.mxu1 %vm120_vm0, %v78_v41 }
  0x32   :  { %369 = vmatmul.msk.f32.gmra.mxu2 %vm120_vm0, %v78_v41  ;;  %372 = vmatmul.msk.f32.gmra.mxu3 %vm120_vm0, %v78_v41 }
  0x39   :  { %364 = vmatmul.msk.f32.gmra.mxu0 %vm120_vm0, %v79_v42  ;;  %367 = vmatmul.msk.f32.gmra.mxu1 %vm120_vm0, %v79_v42 }
  0x3a   :  { %370 = vmatmul.msk.f32.gmra.mxu2 %vm120_vm0, %v79_v42  ;;  %373 = vmatmul.msk.f32.gmra.mxu3 %vm120_vm0, %v79_v42 }
  0xa6   :  { %v147_v43 = vpop.f32.mrf.mxu0  ;;  %v173_v44 = vpop.f32.mrf.mxu1 }
  0xa7   :  { %v234_v57 = vmax.f32 %v147_v43, 0.0  ;;  %v235_v58 = vmax.f32 %v173_v44, 0.0 }
  0xad   :  { %v199_v45 = vpop.f32.mrf.mxu2  ;;  %v225_v46 = vpop.f32.mrf.mxu3 }
  0xae   :  { %v150_v47 = vpop.f32.mrf.mxu0  ;;  %v176_v48 = vpop.f32.mrf.mxu1  ;;  %v236_v2 = vmax.f32 %v199_v45, 0.0  ;;  %v237_v3 = vmax.f32 %v225_v46, 0.0 }
  0xaf   :  { %v238_v53 = vmax.f32 %v150_v47, 0.0  ;;  %v239_v54 = vmax.f32 %v176_v48, 0.0 }
  0xb5   :  { %v202_v49 = vpop.f32.mrf.mxu2  ;;  %v228_v50 = vpop.f32.mrf.mxu3 }
  0xb6   :  { %v153_v51 = vpop.f32.mrf.mxu0  ;;  %v179_v52 = vpop.f32.mrf.mxu1  ;;  %v240_v0 = vmax.f32 %v202_v49, 0.0  ;;  %v241_v1 = vmax.f32 %v228_v50, 0.0 }
  0xb7   :  { %v242_v55 = vmax.f32 %v153_v51, 0.0  ;;  %v243_v56 = vmax.f32 %v179_v52, 0.0 }
  0xb9   :  { %268 = vmatpush.msrb.mxu0 %v242_v55  ;;  %288 = vmatpush.msrb.mxu1 %v243_v56 }
  0xbb   :  { %269 = vmatpush.msrb.mxu0 %v238_v53  ;;  %289 = vmatpush.msrb.mxu1 %v239_v54 }
  0xbd   :  { %v205_v59 = vpop.f32.mrf.mxu2  ;;  %v231_v60 = vpop.f32.mrf.mxu3  ;;  %270 = vmatpush.msrb.mxu0 %v234_v57  ;;  %290 = vmatpush.msrb.mxu1 %v235_v58 }
  0xbe   :  { %v244_v62 = vmax.f32 %v205_v59, 0.0  ;;  %v245_v63 = vmax.f32 %v231_v60, 0.0  ;;  %374 = vmatmul.msk.f32.vlgmr.msrb.gmra.mxu0 %vm251_vm1, %v246_v61  ;;  %375 = vmatmul.msk.f32.vlgmr.msrb.gmra.mxu1 %vm251_vm1, %v246_v61 }
  0xc0   :  { %308 = vmatpush.msrb.mxu2 %v244_v62  ;;  %328 = vmatpush.msrb.mxu3 %v245_v63 }
  0xc2   :  { %309 = vmatpush.msrb.mxu2 %v240_v0  ;;  %329 = vmatpush.msrb.mxu3 %v241_v1 }
  0xc4   :  { %310 = vmatpush.msrb.mxu2 %v236_v2  ;;  %330 = vmatpush.msrb.mxu3 %v237_v3 }
  0xc5   :  { %376 = vmatmul.msk.f32.vlgmr.msrb.gmra.mxu2 %vm251_vm1, %v246_v61  ;;  %377 = vmatmul.msk.f32.vlgmr.msrb.gmra.mxu3 %vm251_vm1, %v246_v61 }
 0x13b   :  { %v272_v6 = vpop.f32.mrf.mxu0  ;;  %v292_v7 = vpop.f32.mrf.mxu1 }
 0x13c   :  { %v273_v8 = vadd.f32 %v272_v6, %v247_v4  ;;  %v293_v9 = vadd.f32 %v292_v7, %v248_v5 }
 0x13e   :  { %v335_v10 = vmax.f32 %v273_v8, 0.0  ;;  %v336_v11 = vmax.f32 %v293_v9, 0.0 }
 0x140   :  { %339 = vst [vmem:[#allocation10] sm:$0xff] %v335_v10 }
 0x141   :  { %340 = vst [vmem:[#allocation10 + $0x8] sm:$0xff] %v336_v11 }
 0x148   :  { %v312_v14 = vpop.f32.mrf.mxu2  ;;  %v332_v15 = vpop.f32.mrf.mxu3 }
 0x149   :  { %v313_v16 = vadd.f32 %v312_v14, %v249_v12  ;;  %v333_v17 = vadd.f32 %v332_v15, %v250_v13 }
 0x14b   :  { %v337_v18 = vmax.f32 %v313_v16, 0.0  ;;  %v338_v19 = vmax.f32 %v333_v17, 0.0 }
 0x14d   :  { %341 = vst [vmem:[#allocation10 + $0x10] sm:$0xff] %v337_v18 }
 0x14e   :  { %342 = vst [vmem:[#allocation10 + $0x18] sm:$0xff] %v338_v19 }
 0x14f   :  { %353 = dma.vmem_to_hbm [thread:$0]  %s349_s3, 512, %s351_s13, [#allocation4]  }
 0x150   :  { %513 = dma.done.wait [#allocation4], 512  }
 0x151   :  { %514 = vsyncadd [#allocation4], 4294966784 }
 0x152   :  { %358 = vsyncpa [#allocation3], 1 }
 0x153   :  { %359 = vsyncpa [#allocation6], 1 }
 0x154   :  { %360 = vsyncpa [#allocation9], 1 }
 0x155   :  { %361 = vsyncpa [#allocation4], 1 }

</bundles_post_ra>
